<compile_context>
chip_gen: v6e
topology: v6e:2x2x1
jax: 0.10.0
libtpu: 0.0.40
codegen_flags: <defaults>
</compile_context>

<pallas_src>
import functools

import jax
import jax.numpy as jnp
from jax.experimental import pallas as pl
from jax.experimental.pallas import tpu as pltpu


def _leaky_relu(x, negative_slope=0.01):
    # nn.LeakyReLU() default slope 0.01.  For 0 < a < 1, max(x, a*x) ==
    # where(x > 0, x, a*x) and lowers to a single vmax (+ vmul).
    return jnp.maximum(x, negative_slope * x)


def _round_up(x, m):
    return ((x + m - 1) // m) * m


def encoder_mlp_kernel(n_steps, stream_wh,
                       x_ref,
                       w_in_ref, b_in_ref,
                       w_h_ref, b_h_ref,
                       w_head_ref, b_head_ref,
                       out_ref,
                       *scratch):
    """Fused MLP forward: (Linear+LeakyReLU) x (1+n_steps) + fused mu|logvar head.

    Matmul operands arrive pre-cast (bf16 in production, f32 for the tight
    correctness check); accumulation is f32 via preferred_element_type and
    the element-wise (bias + activation) path is f32.
    """
    mm_dtype = w_in_ref.dtype

    # Input layer.
    h = jnp.dot(x_ref[...], w_in_ref[...], preferred_element_type=jnp.float32)
    h = _leaky_relu(h + b_in_ref[...])

    if stream_wh and n_steps > 0:
        # Hidden-layer weights live in HBM; double-buffer them layer-by-layer so
        # only 2 layers of weights are ever VMEM-resident (v7x 64 MiB budget).
        wh_buf, sem = scratch

        def start_fetch(layer, slot):
            pltpu.make_async_copy(w_h_ref.at[layer], wh_buf.at[slot],
                                  sem.at[slot]).start()

        def wait_fetch(slot):
            pltpu.make_async_copy(w_h_ref.at[0], wh_buf.at[slot],
                                  sem.at[slot]).wait()

        start_fetch(0, 0)
        for i in range(n_steps):                 # static unroll: n_steps is small
            slot = i & 1
            wait_fetch(slot)
            if i + 1 < n_steps:
                start_fetch(i + 1, 1 - slot)     # overlap next layer DMA with matmul
            h = jnp.dot(h.astype(mm_dtype), wh_buf[slot],
                        preferred_element_type=jnp.float32) + b_h_ref[i]
            h = _leaky_relu(h)
    else:
        for i in range(n_steps):                 # static unroll, weights resident
            h = jnp.dot(h.astype(mm_dtype), w_h_ref[i],
                        preferred_element_type=jnp.float32) + b_h_ref[i]
            h = _leaky_relu(h)

    # Fused mu|logvar head: one matmul, one lane-dense (tile_b, d_head_p) store.
    out_ref[...] = (jnp.dot(h.astype(mm_dtype), w_head_ref[...],
                            preferred_element_type=jnp.float32)
                    + b_head_ref[...])


def init_params(key, dim_input, dim_output, dim_hidden, n_steps):
    """PyTorch-style kaiming_normal_ (defaults: a=0, fan_in, leaky_relu gain sqrt(2))."""
    ks = jax.random.split(key, 4 + n_steps)

    def kaiming(k, fan_in, fan_out):
        std = jnp.sqrt(2.0 / fan_in)
        return jax.random.normal(k, (fan_in, fan_out), jnp.float32) * std

    return {
        "w_in": kaiming(ks[0], dim_input, dim_hidden),
        "b_in": jnp.zeros((1, dim_hidden), jnp.float32),
        "w_h": jnp.stack([kaiming(ks[1 + i], dim_hidden, dim_hidden)
                          for i in range(n_steps)], axis=0),
        "b_h": jnp.zeros((n_steps, 1, dim_hidden), jnp.float32),
        "w_mu": kaiming(ks[1 + n_steps], dim_hidden, dim_output),
        "b_mu": jnp.zeros((1, dim_output), jnp.float32),
        "w_lv": kaiming(ks[2 + n_steps], dim_hidden, dim_output),
        "b_lv": jnp.zeros((1, dim_output), jnp.float32),
    }


def prepare_padded_params(params, *, use_bf16=True):
    """Fuse mu/logvar heads, zero-pad lane dims to multiples of 128, pre-cast.

    Zero padding is exact: padded input columns hit zero weight rows, padded
    hidden columns stay exactly 0 through bias-add and LeakyReLU, and padded
    head columns are sliced away in the wrapper.  Matmul operands are
    pre-cast to bf16 (production default) so no per-tile casts of resident
    weights happen inside the kernel; biases remain f32.
    """
    d_in, d_hid = params["w_in"].shape
    d_out = params["w_mu"].shape[1]
    n_steps = params["w_h"].shape[0]

    d_in_p = _round_up(d_in, 128)
    d_hid_p = _round_up(d_hid, 128)
    d_head_p = _round_up(2 * d_out, 128)

    mm_dtype = jnp.bfloat16 if use_bf16 else jnp.float32

    def pad2(a, r, c):
        return jnp.pad(a, ((0, r - a.shape[0]), (0, c - a.shape[1])))

    w_head = jnp.concatenate([params["w_mu"], params["w_lv"]], axis=1)
    b_head = jnp.concatenate([params["b_mu"], params["b_lv"]], axis=1)

    padded = {
        "w_in": pad2(params["w_in"], d_in_p, d_hid_p).astype(mm_dtype),
        "b_in": pad2(params["b_in"], 1, d_hid_p),
        "w_h": jnp.pad(params["w_h"],
                       ((0, 0), (0, d_hid_p - d_hid),
                        (0, d_hid_p - d_hid))).astype(mm_dtype),
        "b_h": jnp.pad(params["b_h"], ((0, 0), (0, 0), (0, d_hid_p - d_hid))),
        "w_head": pad2(w_head, d_hid_p, d_head_p).astype(mm_dtype),
        "b_head": pad2(b_head, 1, d_head_p),
    }
    meta = {"d_in": d_in, "d_hid": d_hid, "d_out": d_out, "n_steps": n_steps,
            "d_in_p": d_in_p, "d_hid_p": d_hid_p, "d_head_p": d_head_p}
    return padded, meta


def _choose_batch_tiling(B, max_tile=512):
    """Even split so the last tile is not mostly padding; >=2 (even) tiles for
    large batches so the "parallel" grid axis shards across v7x's 2 TCs."""
    n_tiles = -(-B // max_tile)
    if n_tiles == 1 and B >= 512:
        n_tiles = 2
    if n_tiles > 1 and n_tiles % 2:
        n_tiles += 1
    tile_b = _round_up(-(-B // n_tiles), 8)
    return tile_b, n_tiles


def encoder_mlp_forward(x, padded_params, meta, *, stream_wh=None, max_tile_b=512):
    B = x.shape[0]
    n_steps = meta["n_steps"]
    d_out = meta["d_out"]
    d_in_p, d_hid_p, d_head_p = meta["d_in_p"], meta["d_hid_p"], meta["d_head_p"]

    tile_b, n_tiles = _choose_batch_tiling(B, max_tile=max_tile_b)
    B_p = tile_b * n_tiles

    mm_dtype = padded_params["w_in"].dtype
    mm_bytes = padded_params["w_in"].dtype.itemsize

    # Physical VMEM on this chip (v5e/v6e: 128 MiB, v7x: 64 MiB).
    try:
        vmem_cap = int(pltpu.get_tpu_info().vmem_capacity_bytes)
    except Exception:
        vmem_cap = 64 << 20

    w_args = (padded_params["w_in"], padded_params["b_in"],
              padded_params["w_h"], padded_params["b_h"],
              padded_params["w_head"], padded_params["b_head"])
    weight_bytes = sum(int(a.size) * a.dtype.itemsize for a in w_args)
    wh_bytes = int(padded_params["w_h"].size) * mm_bytes
    io_bytes = 2 * tile_b * (d_in_p * mm_bytes + d_head_p * 4)
    act_bytes = 6 * tile_b * max(d_hid_p, d_head_p) * 4

    if stream_wh is None:
        # Budget assuming worst-case double-buffered resident weights; stream the
        # hidden stack from HBM if it would blow the physical VMEM (v7x case).
        stream_wh = (2 * weight_bytes + io_bytes + act_bytes) > int(0.75 * vmem_cap)

    resident_bytes = (2 * (weight_bytes - (wh_bytes if stream_wh else 0))
                      + (2 * d_hid_p * d_hid_p * mm_bytes if stream_wh else 0)
                      + io_bytes + act_bytes)
    vmem_limit = int(min(vmem_cap, max(32 << 20, resident_bytes + (8 << 20))))

    # Single fused cast+pad of x (skipped when already aligned).
    x_c = x if x.dtype == mm_dtype else x.astype(mm_dtype)
    if x_c.shape != (B_p, d_in_p):
        x_c = jnp.pad(x_c, ((0, B_p - B), (0, d_in_p - x.shape[1])))

    flops = 2 * B_p * (d_in_p * d_hid_p + n_steps * d_hid_p * d_hid_p
                       + d_hid_p * d_head_p)
    bytes_accessed = (int(x_c.size) * mm_bytes
                      + (weight_bytes - wh_bytes)
                      + wh_bytes * (n_tiles if stream_wh else 1)
                      + B_p * d_head_p * 4)
    cost = pl.CostEstimate(flops=int(flops), transcendentals=0,
                           bytes_accessed=int(bytes_accessed))

    def build_in_specs(single_buffer_weights):
        def invariant_spec(a):
            zeros = (0,) * a.ndim
            if single_buffer_weights:
                # Grid-invariant block: one VMEM buffer is enough (it is never
                # re-fetched across batch tiles).
                return pl.BlockSpec(a.shape, lambda i, z=zeros: z,
                                    pipeline_mode=pl.Buffered(1))
            return pl.BlockSpec(a.shape, lambda i, z=zeros: z)

        wh_spec = (pl.BlockSpec(memory_space=pl.ANY) if stream_wh
                   else invariant_spec(padded_params["w_h"]))
        return [pl.BlockSpec((tile_b, d_in_p), lambda i: (i, 0)),
                invariant_spec(padded_params["w_in"]),
                invariant_spec(padded_params["b_in"]),
                wh_spec,
                invariant_spec(padded_params["b_h"]),
                invariant_spec(padded_params["w_head"]),
                invariant_spec(padded_params["b_head"])]

    scratch_shapes = []
    if stream_wh:
        scratch_shapes = [pltpu.VMEM((2, d_hid_p, d_hid_p), mm_dtype),
                          pltpu.SemaphoreType.DMA((2,))]

    def run(single_buffer_weights):
        return pl.pallas_call(
            functools.partial(encoder_mlp_kernel, n_steps, stream_wh),
            out_shape=jax.ShapeDtypeStruct((B_p, d_head_p), jnp.float32),
            grid=(n_tiles,),
            in_specs=build_in_specs(single_buffer_weights),
            out_specs=pl.BlockSpec((tile_b, d_head_p), lambda i: (i, 0)),
            scratch_shapes=scratch_shapes,
            compiler_params=pltpu.CompilerParams(
                dimension_semantics=("parallel",),
                vmem_limit_bytes=vmem_limit),
            cost_estimate=cost,
        )(x_c, *w_args)

    try:
        out = run(single_buffer_weights=True)
    except Exception:
        # pipeline_mode=Buffered(1) not supported on this jax/Mosaic version:
        # fall back to default (double-buffered) invariant weight blocks.
        out = run(single_buffer_weights=False)

    mu = out[:B, :d_out]
    logvar = out[:B, d_out:2 * d_out]
    return mu, logvar


def reference_forward(x, params, n_steps):
    """Pure-JAX f32 reference mirroring the PyTorch module."""
    h = _leaky_relu(x @ params["w_in"] + params["b_in"])
    for i in range(n_steps):
        h = _leaky_relu(h @ params["w_h"][i] + params["b_h"][i])
    h = jnp.squeeze(h)  # torch x.squeeze(): no-op for batch > 1
    mu = h @ params["w_mu"] + params["b_mu"]
    lv = h @ params["w_lv"] + params["b_lv"]
    return mu, lv


if __name__ == "__main__":
    # Small shapes consistent with the module's forward.
    B, D_IN, D_HID, D_OUT, N_STEPS = 8, 32, 64, 32, 2

    key = jax.random.PRNGKey(0)
    k_x, k_p, k_x2 = jax.random.split(key, 3)

    x = jax.random.normal(k_x, (B, D_IN), jnp.float32)
    params = init_params(k_p, D_IN, D_OUT, D_HID, N_STEPS)
    mu_ref, lv_ref = reference_forward(x, params, N_STEPS)

    # 1) f32 operands, resident weights: tight numeric check of the fused kernel.
    pp32, meta32 = prepare_padded_params(params, use_bf16=False)
    mu, lv = encoder_mlp_forward(x, pp32, meta32)
    mu = jax.block_until_ready(mu)
    lv = jax.block_until_ready(lv)
    assert mu.shape == mu_ref.shape and lv.shape == lv_ref.shape
    assert jnp.allclose(mu, mu_ref, atol=1e-5, rtol=1e-5)
    assert jnp.allclose(lv, lv_ref, atol=1e-5, rtol=1e-5)

    # 2) f32 operands with hidden weights streamed from HBM (v7x big-model path).
    mu_s, lv_s = encoder_mlp_forward(x, pp32, meta32, stream_wh=True)
    mu_s = jax.block_until_ready(mu_s)
    assert jnp.allclose(mu_s, mu_ref, atol=1e-5, rtol=1e-5)
    assert jnp.allclose(lv_s, lv_ref, atol=1e-5, rtol=1e-5)

    # 3) bf16 matmul operands (production default): looser tolerance vs f32 ref.
    ppbf, metabf = prepare_padded_params(params, use_bf16=True)
    mu_b, lv_b = encoder_mlp_forward(x, ppbf, metabf)
    mu_b = jax.block_until_ready(mu_b)
    assert jnp.allclose(mu_b, mu_ref, atol=5e-2, rtol=5e-2)
    assert jnp.allclose(lv_b, lv_ref, atol=5e-2, rtol=5e-2)

    # 4) multi-tile batch grid (2 "parallel" tiles, last tile partially padded).
    x_big = jax.random.normal(k_x2, (600, D_IN), jnp.float32)
    mu_big_ref, lv_big_ref = reference_forward(x_big, params, N_STEPS)
    mu_big, lv_big = encoder_mlp_forward(x_big, pp32, meta32)
    mu_big = jax.block_until_ready(mu_big)
    assert jnp.allclose(mu_big, mu_big_ref, atol=1e-5, rtol=1e-5)
    assert jnp.allclose(lv_big, lv_big_ref, atol=1e-5, rtol=1e-5)

    print("KERNEL_OK")
</pallas_src>

<mosaic_0001>
module attributes {stable_mosaic.version = 11 : i64} {
  func.func @encoder_mlp_kernel(%arg0: i32, %arg1: memref<8x128xf32, #tpu.memory_space<vmem>>, %arg2: memref<128x128xf32, #tpu.memory_space<vmem>>, %arg3: memref<1x128xf32, #tpu.memory_space<vmem>>, %arg4: memref<2x128x128xf32, #tpu.memory_space<vmem>>, %arg5: memref<2x1x128xf32, #tpu.memory_space<vmem>>, %arg6: memref<128x128xf32, #tpu.memory_space<vmem>>, %arg7: memref<1x128xf32, #tpu.memory_space<vmem>>, %arg8: memref<8x128xf32, #tpu.memory_space<vmem>>) attributes {dimension_semantics = [#tpu.dimension_semantics<parallel>], iteration_bounds = array<i64: 1>, scalar_prefetch = 0 : i64, scratch_operands = 0 : i64, tpu.core_type = #tpu.core_type<tc>, window_params = [{transform_indices = @transform_0, window_bounds = array<i64: 8, 128>}, {pipeline_mode = #tpu.pipeline_mode<synchronous>, transform_indices = @transform_1, window_bounds = array<i64: 128, 128>}, {pipeline_mode = #tpu.pipeline_mode<synchronous>, transform_indices = @transform_2, window_bounds = array<i64: 1, 128>}, {pipeline_mode = #tpu.pipeline_mode<synchronous>, transform_indices = @transform_3, window_bounds = array<i64: 2, 128, 128>}, {pipeline_mode = #tpu.pipeline_mode<synchronous>, transform_indices = @transform_4, window_bounds = array<i64: 2, 1, 128>}, {pipeline_mode = #tpu.pipeline_mode<synchronous>, transform_indices = @transform_5, window_bounds = array<i64: 128, 128>}, {pipeline_mode = #tpu.pipeline_mode<synchronous>, transform_indices = @transform_6, window_bounds = array<i64: 1, 128>}, {transform_indices = @transform_7, window_bounds = array<i64: 8, 128>}]} {
    %c0 = arith.constant 0 : index
    %c0_0 = arith.constant 0 : index
    %0 = vector.load %arg1[%c0, %c0_0] : memref<8x128xf32, #tpu.memory_space<vmem>>, vector<8x128xf32>
    %c0_1 = arith.constant 0 : index
    %c0_2 = arith.constant 0 : index
    %1 = vector.load %arg2[%c0_1, %c0_2] : memref<128x128xf32, #tpu.memory_space<vmem>>, vector<128x128xf32>
    %cst = arith.constant dense<0.000000e+00> : vector<8x128xf32>
    %2 = tpu.matmul %0, %1, %cst {dimension_numbers = #tpu.dot_dimension_numbers<[1], [0], [0], [1], [0, 0, 1, 1], [], []>} : vector<8x128xf32>, vector<128x128xf32>, vector<8x128xf32> -> vector<8x128xf32>
    %c0_3 = arith.constant 0 : index
    %c0_4 = arith.constant 0 : index
    %3 = vector.load %arg3[%c0_3, %c0_4] : memref<1x128xf32, #tpu.memory_space<vmem>>, vector<1x128xf32>
    %4 = vector.broadcast %3 : vector<1x128xf32> to vector<8x128xf32>
    %5 = arith.addf %2, %4 : vector<8x128xf32>
    %cst_5 = arith.constant 0.00999999977 : f32
    %6 = vector.broadcast %cst_5 : f32 to vector<8x128xf32>
    %7 = arith.mulf %6, %5 : vector<8x128xf32>
    %8 = arith.maximumf %5, %7 : vector<8x128xf32>
    %c0_6 = arith.constant 0 : index
    %c0_7 = arith.constant 0 : index
    %c0_8 = arith.constant 0 : index
    %9 = vector.load %arg4[%c0_6, %c0_7, %c0_8] : memref<2x128x128xf32, #tpu.memory_space<vmem>>, vector<1x128x128xf32>
    %10 = vector.shape_cast %9 : vector<1x128x128xf32> to vector<128x128xf32>
    %cst_9 = arith.constant dense<0.000000e+00> : vector<8x128xf32>
    %11 = tpu.matmul %8, %10, %cst_9 {dimension_numbers = #tpu.dot_dimension_numbers<[1], [0], [0], [1], [0, 0, 1, 1], [], []>} : vector<8x128xf32>, vector<128x128xf32>, vector<8x128xf32> -> vector<8x128xf32>
    %c0_10 = arith.constant 0 : index
    %c0_11 = arith.constant 0 : index
    %c0_12 = arith.constant 0 : index
    %12 = vector.load %arg5[%c0_10, %c0_11, %c0_12] : memref<2x1x128xf32, #tpu.memory_space<vmem>>, vector<1x1x128xf32>
    %13 = vector.shape_cast %12 : vector<1x1x128xf32> to vector<1x128xf32>
    %14 = vector.broadcast %13 : vector<1x128xf32> to vector<8x128xf32>
    %15 = arith.addf %11, %14 : vector<8x128xf32>
    %cst_13 = arith.constant 0.00999999977 : f32
    %16 = vector.broadcast %cst_13 : f32 to vector<8x128xf32>
    %17 = arith.mulf %16, %15 : vector<8x128xf32>
    %18 = arith.maximumf %15, %17 : vector<8x128xf32>
    %c1 = arith.constant 1 : index
    %c0_14 = arith.constant 0 : index
    %c0_15 = arith.constant 0 : index
    %19 = vector.load %arg4[%c1, %c0_14, %c0_15] : memref<2x128x128xf32, #tpu.memory_space<vmem>>, vector<1x128x128xf32>
    %20 = vector.shape_cast %19 : vector<1x128x128xf32> to vector<128x128xf32>
    %cst_16 = arith.constant dense<0.000000e+00> : vector<8x128xf32>
    %21 = tpu.matmul %18, %20, %cst_16 {dimension_numbers = #tpu.dot_dimension_numbers<[1], [0], [0], [1], [0, 0, 1, 1], [], []>} : vector<8x128xf32>, vector<128x128xf32>, vector<8x128xf32> -> vector<8x128xf32>
    %c1_17 = arith.constant 1 : index
    %c0_18 = arith.constant 0 : index
    %c0_19 = arith.constant 0 : index
    %22 = vector.load %arg5[%c1_17, %c0_18, %c0_19] : memref<2x1x128xf32, #tpu.memory_space<vmem>>, vector<1x1x128xf32>
    %23 = vector.shape_cast %22 : vector<1x1x128xf32> to vector<1x128xf32>
    %24 = vector.broadcast %23 : vector<1x128xf32> to vector<8x128xf32>
    %25 = arith.addf %21, %24 : vector<8x128xf32>
    %cst_20 = arith.constant 0.00999999977 : f32
    %26 = vector.broadcast %cst_20 : f32 to vector<8x128xf32>
    %27 = arith.mulf %26, %25 : vector<8x128xf32>
    %28 = arith.maximumf %25, %27 : vector<8x128xf32>
    %c0_21 = arith.constant 0 : index
    %c0_22 = arith.constant 0 : index
    %29 = vector.load %arg6[%c0_21, %c0_22] : memref<128x128xf32, #tpu.memory_space<vmem>>, vector<128x128xf32>
    %cst_23 = arith.constant dense<0.000000e+00> : vector<8x128xf32>
    %30 = tpu.matmul %28, %29, %cst_23 {dimension_numbers = #tpu.dot_dimension_numbers<[1], [0], [0], [1], [0, 0, 1, 1], [], []>} : vector<8x128xf32>, vector<128x128xf32>, vector<8x128xf32> -> vector<8x128xf32>
    %c0_24 = arith.constant 0 : index
    %c0_25 = arith.constant 0 : index
    %31 = vector.load %arg7[%c0_24, %c0_25] : memref<1x128xf32, #tpu.memory_space<vmem>>, vector<1x128xf32>
    %32 = vector.broadcast %31 : vector<1x128xf32> to vector<8x128xf32>
    %33 = arith.addf %30, %32 : vector<8x128xf32>
    %c0_26 = arith.constant 0 : index
    %c0_27 = arith.constant 0 : index
    %34 = vector.load %arg8[%c0_26, %c0_27] : memref<8x128xf32, #tpu.memory_space<vmem>>, vector<8x128xf32>
    tpu.vector_store %arg8[%c0_26, %c0_27], %33 {strides = array<i32>} : memref<8x128xf32, #tpu.memory_space<vmem>>, vector<8x128xf32>,
    return
  }
  func.func @transform_0(%arg0: i32) -> (i32, i32) {
    %c0_i32 = arith.constant 0 : i32
    %c0_i32_0 = arith.constant 0 : i32
    return %arg0, %c0_i32 : i32, i32
  }
  func.func @transform_1(%arg0: i32) -> (i32, i32) {
    %c0_i32 = arith.constant 0 : i32
    %c0_i32_0 = arith.constant 0 : i32
    %c0_i32_1 = arith.constant 0 : i32
    return %c0_i32, %c0_i32_0 : i32, i32
  }
  func.func @transform_2(%arg0: i32) -> (i32, i32) {
    %c0_i32 = arith.constant 0 : i32
    %c0_i32_0 = arith.constant 0 : i32
    %c0_i32_1 = arith.constant 0 : i32
    return %c0_i32, %c0_i32_0 : i32, i32
  }
  func.func @transform_3(%arg0: i32) -> (i32, i32, i32) {
    %c0_i32 = arith.constant 0 : i32
    %c0_i32_0 = arith.constant 0 : i32
    %c0_i32_1 = arith.constant 0 : i32
    %c0_i32_2 = arith.constant 0 : i32
    return %c0_i32, %c0_i32_0, %c0_i32_1 : i32, i32, i32
  }
  func.func @transform_4(%arg0: i32) -> (i32, i32, i32) {
    %c0_i32 = arith.constant 0 : i32
    %c0_i32_0 = arith.constant 0 : i32
    %c0_i32_1 = arith.constant 0 : i32
    %c0_i32_2 = arith.constant 0 : i32
    return %c0_i32, %c0_i32_0, %c0_i32_1 : i32, i32, i32
  }
  func.func @transform_5(%arg0: i32) -> (i32, i32) {
    %c0_i32 = arith.constant 0 : i32
    %c0_i32_0 = arith.constant 0 : i32
    %c0_i32_1 = arith.constant 0 : i32
    return %c0_i32, %c0_i32_0 : i32, i32
  }
  func.func @transform_6(%arg0: i32) -> (i32, i32) {
    %c0_i32 = arith.constant 0 : i32
    %c0_i32_0 = arith.constant 0 : i32
    %c0_i32_1 = arith.constant 0 : i32
    return %c0_i32, %c0_i32_0 : i32, i32
  }
  func.func @transform_7(%arg0: i32) -> (i32, i32) {
    %c0_i32 = arith.constant 0 : i32
    %c0_i32_0 = arith.constant 0 : i32
    return %arg0, %c0_i32 : i32, i32
  }
}

module attributes {stable_mosaic.version = 11 : i64} {
  func.func @encoder_mlp_kernel(%arg0: i32, %arg1: memref<8x128xf32, #tpu.memory_space<vmem>>, %arg2: memref<128x128xf32, #tpu.memory_space<vmem>>, %arg3: memref<1x128xf32, #tpu.memory_space<vmem>>, %arg4: memref<2x128x128xf32, #tpu.memory_space<vmem>>, %arg5: memref<2x1x128xf32, #tpu.memory_space<vmem>>, %arg6: memref<128x128xf32, #tpu.memory_space<vmem>>, %arg7: memref<1x128xf32, #tpu.memory_space<vmem>>, %arg8: memref<8x128xf32, #tpu.memory_space<vmem>>) attributes {dimension_semantics = [#tpu.dimension_semantics<parallel>], iteration_bounds = array<i64: 1>, scalar_prefetch = 0 : i64, scratch_operands = 0 : i64, tpu.core_type = #tpu.core_type<tc>, window_params = [{transform_indices = @transform_0, window_bounds = array<i64: 8, 128>}, {pipeline_mode = #tpu.pipeline_mode<synchronous>, transform_indices = @transform_1, window_bounds = array<i64: 128, 128>}, {pipeline_mode = #tpu.pipeline_mode<synchronous>, transform_indices = @transform_2, window_bounds = array<i64: 1, 128>}, {pipeline_mode = #tpu.pipeline_mode<synchronous>, transform_indices = @transform_3, window_bounds = array<i64: 2, 128, 128>}, {pipeline_mode = #tpu.pipeline_mode<synchronous>, transform_indices = @transform_4, window_bounds = array<i64: 2, 1, 128>}, {pipeline_mode = #tpu.pipeline_mode<synchronous>, transform_indices = @transform_5, window_bounds = array<i64: 128, 128>}, {pipeline_mode = #tpu.pipeline_mode<synchronous>, transform_indices = @transform_6, window_bounds = array<i64: 1, 128>}, {transform_indices = @transform_7, window_bounds = array<i64: 8, 128>}]} {
    %c0 = arith.constant 0 : index
    %c0_0 = arith.constant 0 : index
    %0 = vector.load %arg1[%c0, %c0_0] : memref<8x128xf32, #tpu.memory_space<vmem>>, vector<8x128xf32>
    %c0_1 = arith.constant 0 : index
    %c0_2 = arith.constant 0 : index
    %1 = vector.load %arg2[%c0_1, %c0_2] : memref<128x128xf32, #tpu.memory_space<vmem>>, vector<128x128xf32>
    %cst = arith.constant dense<0.000000e+00> : vector<8x128xf32>
    %2 = tpu.matmul %0, %1, %cst {dimension_numbers = #tpu.dot_dimension_numbers<[1], [0], [0], [1], [0, 0, 1, 1], [], []>} : vector<8x128xf32>, vector<128x128xf32>, vector<8x128xf32> -> vector<8x128xf32>
    %c0_3 = arith.constant 0 : index
    %c0_4 = arith.constant 0 : index
    %3 = vector.load %arg3[%c0_3, %c0_4] : memref<1x128xf32, #tpu.memory_space<vmem>>, vector<1x128xf32>
    %4 = vector.broadcast %3 : vector<1x128xf32> to vector<8x128xf32>
    %5 = arith.addf %2, %4 : vector<8x128xf32>
    %cst_5 = arith.constant 0.00999999977 : f32
    %6 = vector.broadcast %cst_5 : f32 to vector<8x128xf32>
    %7 = arith.mulf %6, %5 : vector<8x128xf32>
    %8 = arith.maximumf %5, %7 : vector<8x128xf32>
    %c0_6 = arith.constant 0 : index
    %c0_7 = arith.constant 0 : index
    %c0_8 = arith.constant 0 : index
    %9 = vector.load %arg4[%c0_6, %c0_7, %c0_8] : memref<2x128x128xf32, #tpu.memory_space<vmem>>, vector<1x128x128xf32>
    %10 = vector.shape_cast %9 : vector<1x128x128xf32> to vector<128x128xf32>
    %cst_9 = arith.constant dense<0.000000e+00> : vector<8x128xf32>
    %11 = tpu.matmul %8, %10, %cst_9 {dimension_numbers = #tpu.dot_dimension_numbers<[1], [0], [0], [1], [0, 0, 1, 1], [], []>} : vector<8x128xf32>, vector<128x128xf32>, vector<8x128xf32> -> vector<8x128xf32>
    %c0_10 = arith.constant 0 : index
    %c0_11 = arith.constant 0 : index
    %c0_12 = arith.constant 0 : index
    %12 = vector.load %arg5[%c0_10, %c0_11, %c0_12] : memref<2x1x128xf32, #tpu.memory_space<vmem>>, vector<1x1x128xf32>
    %13 = vector.shape_cast %12 : vector<1x1x128xf32> to vector<1x128xf32>
    %14 = vector.broadcast %13 : vector<1x128xf32> to vector<8x128xf32>
    %15 = arith.addf %11, %14 : vector<8x128xf32>
    %cst_13 = arith.constant 0.00999999977 : f32
    %16 = vector.broadcast %cst_13 : f32 to vector<8x128xf32>
    %17 = arith.mulf %16, %15 : vector<8x128xf32>
    %18 = arith.maximumf %15, %17 : vector<8x128xf32>
    %c1 = arith.constant 1 : index
    %c0_14 = arith.constant 0 : index
    %c0_15 = arith.constant 0 : index
    %19 = vector.load %arg4[%c1, %c0_14, %c0_15] : memref<2x128x128xf32, #tpu.memory_space<vmem>>, vector<1x128x128xf32>
    %20 = vector.shape_cast %19 : vector<1x128x128xf32> to vector<128x128xf32>
    %cst_16 = arith.constant dense<0.000000e+00> : vector<8x128xf32>
    %21 = tpu.matmul %18, %20, %cst_16 {dimension_numbers = #tpu.dot_dimension_numbers<[1], [0], [0], [1], [0, 0, 1, 1], [], []>} : vector<8x128xf32>, vector<128x128xf32>, vector<8x128xf32> -> vector<8x128xf32>
    %c1_17 = arith.constant 1 : index
    %c0_18 = arith.constant 0 : index
    %c0_19 = arith.constant 0 : index
    %22 = vector.load %arg5[%c1_17, %c0_18, %c0_19] : memref<2x1x128xf32, #tpu.memory_space<vmem>>, vector<1x1x128xf32>
    %23 = vector.shape_cast %22 : vector<1x1x128xf32> to vector<1x128xf32>
    %24 = vector.broadcast %23 : vector<1x128xf32> to vector<8x128xf32>
    %25 = arith.addf %21, %24 : vector<8x128xf32>
    %cst_20 = arith.constant 0.00999999977 : f32
    %26 = vector.broadcast %cst_20 : f32 to vector<8x128xf32>
    %27 = arith.mulf %26, %25 : vector<8x128xf32>
    %28 = arith.maximumf %25, %27 : vector<8x128xf32>
    %c0_21 = arith.constant 0 : index
    %c0_22 = arith.constant 0 : index
    %29 = vector.load %arg6[%c0_21, %c0_22] : memref<128x128xf32, #tpu.memory_space<vmem>>, vector<128x128xf32>
    %cst_23 = arith.constant dense<0.000000e+00> : vector<8x128xf32>
    %30 = tpu.matmul %28, %29, %cst_23 {dimension_numbers = #tpu.dot_dimension_numbers<[1], [0], [0], [1], [0, 0, 1, 1], [], []>} : vector<8x128xf32>, vector<128x128xf32>, vector<8x128xf32> -> vector<8x128xf32>
    %c0_24 = arith.constant 0 : index
    %c0_25 = arith.constant 0 : index
    %31 = vector.load %arg7[%c0_24, %c0_25] : memref<1x128xf32, #tpu.memory_space<vmem>>, vector<1x128xf32>
    %32 = vector.broadcast %31 : vector<1x128xf32> to vector<8x128xf32>
    %33 = arith.addf %30, %32 : vector<8x128xf32>
    %c0_26 = arith.constant 0 : index
    %c0_27 = arith.constant 0 : index
    %34 = vector.load %arg8[%c0_26, %c0_27] : memref<8x128xf32, #tpu.memory_space<vmem>>, vector<8x128xf32>
    tpu.vector_store %arg8[%c0_26, %c0_27], %33 {strides = array<i32>} : memref<8x128xf32, #tpu.memory_space<vmem>>, vector<8x128xf32>,
    return
  }
  func.func @transform_0(%arg0: i32) -> (i32, i32) {
    %c0_i32 = arith.constant 0 : i32
    %c0_i32_0 = arith.constant 0 : i32
    return %arg0, %c0_i32 : i32, i32
  }
  func.func @transform_1(%arg0: i32) -> (i32, i32) {
    %c0_i32 = arith.constant 0 : i32
    %c0_i32_0 = arith.constant 0 : i32
    %c0_i32_1 = arith.constant 0 : i32
    return %c0_i32, %c0_i32_0 : i32, i32
  }
  func.func @transform_2(%arg0: i32) -> (i32, i32) {
    %c0_i32 = arith.constant 0 : i32
    %c0_i32_0 = arith.constant 0 : i32
    %c0_i32_1 = arith.constant 0 : i32
    return %c0_i32, %c0_i32_0 : i32, i32
  }
  func.func @transform_3(%arg0: i32) -> (i32, i32, i32) {
    %c0_i32 = arith.constant 0 : i32
    %c0_i32_0 = arith.constant 0 : i32
    %c0_i32_1 = arith.constant 0 : i32
    %c0_i32_2 = arith.constant 0 : i32
    return %c0_i32, %c0_i32_0, %c0_i32_1 : i32, i32, i32
  }
  func.func @transform_4(%arg0: i32) -> (i32, i32, i32) {
    %c0_i32 = arith.constant 0 : i32
    %c0_i32_0 = arith.constant 0 : i32
    %c0_i32_1 = arith.constant 0 : i32
    %c0_i32_2 = arith.constant 0 : i32
    return %c0_i32, %c0_i32_0, %c0_i32_1 : i32, i32, i32
  }
  func.func @transform_5(%arg0: i32) -> (i32, i32) {
    %c0_i32 = arith.constant 0 : i32
    %c0_i32_0 = arith.constant 0 : i32
    %c0_i32_1 = arith.constant 0 : i32
    return %c0_i32, %c0_i32_0 : i32, i32
  }
  func.func @transform_6(%arg0: i32) -> (i32, i32) {
    %c0_i32 = arith.constant 0 : i32
    %c0_i32_0 = arith.constant 0 : i32
    %c0_i32_1 = arith.constant 0 : i32
    return %c0_i32, %c0_i32_0 : i32, i32
  }
  func.func @transform_7(%arg0: i32) -> (i32, i32) {
    %c0_i32 = arith.constant 0 : i32
    %c0_i32_0 = arith.constant 0 : i32
    return %arg0, %c0_i32 : i32, i32
  }
}

</mosaic_0001>

<bundles_post_ra>
// kernel: tpu_custom_call.1
= control target key start
LH: loop header
LB: loop body
LE: loop exit
PB: predicated region body
PF: predicated region fallthrough
CT: control target
= control target key end

     0   :  { %12 = vsyncpa [#allocation3], 0  ;;  %s966_s0 = inlined_call_operand.hbm [shape: f32[8,128], index: 0, kind: input, shape index: {}]   ;;  %s967_s1 = inlined_call_operand.hbm [shape: f32[128,128], index: 1, kind: input, shape index: {}]   ;;  %s968_s2 = inlined_call_operand.vmem [shape: f32[1,128], index: 2, kind: input, shape index: {}]   ;;  %s969_s3 = inlined_call_operand.hbm [shape: f32[2,128,128], index: 3, kind: input, shape index: {}]   ;;  %s970_s4 = inlined_call_operand.vmem [shape: f32[2,1,128], index: 4, kind: input, shape index: {}]   ;;  %s971_s5 = inlined_call_operand.hbm [shape: f32[128,128], index: 5, kind: input, shape index: {}]   ;;  %s972_s6 = inlined_call_operand.vmem [shape: f32[1,128], index: 6, kind: input, shape index: {}]   ;;  %s973_s7 = inlined_call_operand.hbm [shape: f32[8,128], index: 7, kind: output, shape index: {}]  }
   0x1   :  { %13 = vsyncpa [#allocation6], 0 }
   0x2   :  { %14 = vsyncpa [#allocation9], 0 }
   0x3   :  { %15 = vsyncpa [#allocation4], 0  ;;  %s809_s24 = smov [#allocation5]  }
   0x4   :  { %s31_s25 = sshll.u32 %s809_s24, 4  ;;  %s32_s25 = int_to_ptr.vmem [resolvable:$true] %s31_s25 }
   0x5   :  { %s709_s26 = scalar_lea.vmem %s32_s25, 2048  ;;  %p714_p1 = scmp.lt.s32.totalorder %s32_s25, %s32_s25 }
   0x6   :  { %p710_p0 = scmp.ne.s32.totalorder %s32_s25, %s709_s26  ;;  %p715_p2 = scmp.lt.s32.totalorder %s709_s26, %s709_s26 }
   0x8   :  { %p716_p3 = por %p715_p2, %p714_p1 }
   0xa   :  { %p717_p4 = pnand %p716_p3, %p710_p0 }
   0xc   :  { %720 = shalt.err (!%p717_p4)
}
   0xd   :  { %s810_s27 = smov 128   ;;  %s811_s28 = smov 8  }
   0xe   :  { %37 = dma.hbm_to_vmem [thread:$0]  %s967_s1, 2048, %s32_s25, [#allocation6], %s810_s27, %s810_s27, %s811_s28  }
   0xf   :  { %s812_s8 = smov [#allocation2]   ;;  %s813_s10 = smov [#allocation7]  }
  0x10   :  { %s22_s9 = sshll.u32 %s812_s8, 4  ;;  %s45_s11 = sshll.u32 %s813_s10, 4  ;;  %s23_s9 = int_to_ptr.vmem [resolvable:$true] %s22_s9  ;;  %s46_s11 = int_to_ptr.vmem [resolvable:$true] %s45_s11 }
  0x11   :  { %s729_s12 = scalar_lea.vmem %s23_s9, 128  ;;  %p734_p6 = scmp.lt.s32.totalorder %s23_s9, %s23_s9 }
  0x12   :  { %p730_p5 = scmp.ne.s32.totalorder %s23_s9, %s729_s12  ;;  %p735_p7 = scmp.lt.s32.totalorder %s729_s12, %s729_s12 }
  0x14   :  { %p736_p8 = por %p735_p7, %p734_p6 }
  0x16   :  { %p737_p9 = pnand %p736_p8, %p730_p5 }
  0x18   :  { %740 = shalt.err (!%p737_p9)
}
  0x19   :  { %25 = dma.hbm_to_vmem [thread:$0]  %s966_s0, 128, %s23_s9, [#allocation3]  }
  0x1a   :  { %s749_s15 = scalar_lea.vmem %s46_s11, 4096  ;;  %p754_p11 = scmp.lt.s32.totalorder %s46_s11, %s46_s11 }
  0x1b   :  { %p750_p10 = scmp.ne.s32.totalorder %s46_s11, %s749_s15  ;;  %p755_p12 = scmp.lt.s32.totalorder %s749_s15, %s749_s15 }
  0x1d   :  { %p756_p13 = por %p755_p12, %p754_p11 }
  0x1f   :  { %p757_p0 = pnand %p756_p13, %p750_p10 }
  0x21   :  { %760 = shalt.err (!%p757_p0)
}
  0x22   :  { %51 = dma.hbm_to_vmem [thread:$0]  %s969_s3, 4096, %s46_s11, [#allocation6], %s810_s27, %s810_s27, %s811_s28  }
  0x23   :  { %s814_s17 = smov [#allocation8]  }
  0x24   :  { %s59_s18 = sshll.u32 %s814_s17, 4  ;;  %s60_s18 = int_to_ptr.vmem [resolvable:$true] %s59_s18 }
  0x25   :  { %s769_s19 = scalar_lea.vmem %s60_s18, 2048  ;;  %p774_p2 = scmp.lt.s32.totalorder %s60_s18, %s60_s18 }
  0x26   :  { %p770_p1 = scmp.ne.s32.totalorder %s60_s18, %s769_s19  ;;  %p775_p3 = scmp.lt.s32.totalorder %s769_s19, %s769_s19 }
  0x28   :  { %p776_p4 = por %p775_p3, %p774_p2 }
  0x2a   :  { %p777_p5 = pnand %p776_p4, %p770_p1 }
  0x2c   :  { %780 = shalt.err (!%p777_p5)
}
  0x2d   :  { %65 = dma.hbm_to_vmem [thread:$0]  %s971_s5, 2048, %s60_s18, [#allocation9], %s810_s27, %s810_s27, %s811_s28  }
  0x2e   :  { %801 = dma.done.wait [#allocation3], 128  }
  0x2f   :  { %802 = vsyncadd [#allocation3], 4294967168 }
  0x30   :  { %803 = dma.done.wait [#allocation6], 6144  }
  0x31   :  { %804 = vsyncadd [#allocation6], 4294961152 }
  0x32   :  { %805 = dma.done.wait [#allocation9], 2048  }
  0x33   :  { %806 = vsyncadd [#allocation9], 4294965248  ;;  %v815_v0 = vmov 0.0   ;;  %vm816_vm0 = vmmov 0   ;;  %v96_v1 = vld [vmem:[#allocation5 + $0x78] sm:$0xff]  ;;  %v95_v2 = vld [vmem:[#allocation5 + $0x70] sm:$0xff] }
  0x34   :  { %552 = vmatprep.subr.mxu0 %v815_v0  ;;  %584 = vmatprep.mubr.msk.f32.mxu0 %vm816_vm0, %v815_v0  ;;  %v94_v3 = vld [vmem:[#allocation5 + $0x68] sm:$0xff]  ;;  %v93_v4 = vld [vmem:[#allocation5 + $0x60] sm:$0xff]  ;;  %v191_v5 = vld [vmem:[#allocation7 + $0x78] sm:$0xff]  ;;  %s817_s26 = smov [#allocation10]  }
  0x35   :  { %587 = vmatprep.subr.mxu1 %v815_v0  ;;  %619 = vmatprep.mubr.msk.f32.mxu1 %vm816_vm0, %v815_v0  ;;  %v92_v6 = vld [vmem:[#allocation5 + $0x58] sm:$0xff]  ;;  %v190_v7 = vld [vmem:[#allocation7 + $0x70] sm:$0xff]  ;;  %v189_v8 = vld [vmem:[#allocation7 + $0x68] sm:$0xff]  ;;  %s468_s27 = sshll.u32 %s817_s26, 4  ;;  %s469_s27 = int_to_ptr.vmem [resolvable:$true] %s468_s27 }
  0x36   :  { %553 = vmatpush3.msra.mxu0 %v96_v1  ;;  %588 = vmatpush3.msra.mxu1 %v191_v5  ;;  %v91_v9 = vld [vmem:[#allocation5 + $0x50] sm:$0xff]  ;;  %v188_v10 = vld [vmem:[#allocation7 + $0x60] sm:$0xff]  ;;  %v90_v11 = vld [vmem:[#allocation5 + $0x48] sm:$0xff]  ;;  %s781_s28 = scalar_lea.vmem %s469_s27, 128  ;;  %p786_p7 = scmp.lt.s32.totalorder %s469_s27, %s469_s27 }
  0x37   :  { %554 = vmatprep.subr.mxu0 %v815_v0  ;;  %589 = vmatprep.subr.mxu1 %v815_v0  ;;  %v187_v12 = vld [vmem:[#allocation7 + $0x58] sm:$0xff]  ;;  %v89_v13 = vld [vmem:[#allocation5 + $0x40] sm:$0xff]  ;;  %v186_v14 = vld [vmem:[#allocation7 + $0x50] sm:$0xff]  ;;  %p782_p6 = scmp.ne.s32.totalorder %s469_s27, %s781_s28  ;;  %p787_p8 = scmp.lt.s32.totalorder %s781_s28, %s781_s28 }
  0x38   :  { %555 = vmatpush3.msra.mxu0 %v95_v2  ;;  %590 = vmatpush3.msra.mxu1 %v190_v7  ;;  %v88_v15 = vld [vmem:[#allocation5 + $0x38] sm:$0xff]  ;;  %v185_v16 = vld [vmem:[#allocation7 + $0x48] sm:$0xff]  ;;  %v87_v17 = vld [vmem:[#allocation5 + $0x30] sm:$0xff] }
  0x39   :  { %556 = vmatprep.subr.mxu0 %v815_v0  ;;  %591 = vmatprep.subr.mxu1 %v815_v0  ;;  %v184_v18 = vld [vmem:[#allocation7 + $0x40] sm:$0xff]  ;;  %v86_v19 = vld [vmem:[#allocation5 + $0x28] sm:$0xff]  ;;  %v183_v20 = vld [vmem:[#allocation7 + $0x38] sm:$0xff]  ;;  %p788_p9 = por %p787_p8, %p786_p7 }
  0x3a   :  { %557 = vmatpush3.msra.mxu0 %v94_v3  ;;  %592 = vmatpush3.msra.mxu1 %v189_v8  ;;  %v85_v21 = vld [vmem:[#allocation5 + $0x20] sm:$0xff]  ;;  %v182_v22 = vld [vmem:[#allocation7 + $0x30] sm:$0xff]  ;;  %v84_v23 = vld [vmem:[#allocation5 + $0x18] sm:$0xff] }
  0x3b   :  { %558 = vmatprep.subr.mxu0 %v815_v0  ;;  %593 = vmatprep.subr.mxu1 %v815_v0  ;;  %v181_v24 = vld [vmem:[#allocation7 + $0x28] sm:$0xff]  ;;  %v83_v25 = vld [vmem:[#allocation5 + $0x10] sm:$0xff]  ;;  %v180_v26 = vld [vmem:[#allocation7 + $0x20] sm:$0xff]  ;;  %p789_p10 = pnand %p788_p9, %p782_p6 }
  0x3c   :  { %559 = vmatpush3.msra.mxu0 %v93_v4  ;;  %594 = vmatpush3.msra.mxu1 %v188_v10  ;;  %v82_v27 = vld [vmem:[#allocation5 + $0x8] sm:$0xff]  ;;  %v81_v28 = vld [vmem:[#allocation5] sm:$0xff]  ;;  %v80_v29 = vld [vmem:[#allocation2] sm:$0xff] }
  0x3d   :  { %560 = vmatprep.subr.mxu0 %v815_v0  ;;  %595 = vmatprep.subr.mxu1 %v815_v0  ;;  %v179_v30 = vld [vmem:[#allocation7 + $0x18] sm:$0xff]  ;;  %v178_v31 = vld [vmem:[#allocation7 + $0x10] sm:$0xff]  ;;  %v177_v32 = vld [vmem:[#allocation7 + $0x8] sm:$0xff] }
  0x3e   :  { %561 = vmatpush3.msra.mxu0 %v92_v6  ;;  %596 = vmatpush3.msra.mxu1 %v187_v12  ;;  %v176_v33 = vld [vmem:[#allocation7] sm:$0xff]  ;;  %v287_v34 = vld [vmem:[#allocation7 + $0xf8] sm:$0xff]  ;;  %v286_v35 = vld [vmem:[#allocation7 + $0xf0] sm:$0xff] }
  0x3f   :  { %562 = vmatprep.subr.mxu0 %v815_v0  ;;  %597 = vmatprep.subr.mxu1 %v815_v0  ;;  %v285_v36 = vld [vmem:[#allocation7 + $0xe8] sm:$0xff]  ;;  %v284_v37 = vld [vmem:[#allocation7 + $0xe0] sm:$0xff]  ;;  %v283_v38 = vld [vmem:[#allocation7 + $0xd8] sm:$0xff] }
  0x40   :  { %563 = vmatpush3.msra.mxu0 %v91_v9  ;;  %598 = vmatpush3.msra.mxu1 %v186_v14  ;;  %v282_v39 = vld [vmem:[#allocation7 + $0xd0] sm:$0xff]  ;;  %v281_v40 = vld [vmem:[#allocation7 + $0xc8] sm:$0xff]  ;;  %v280_v41 = vld [vmem:[#allocation7 + $0xc0] sm:$0xff] }
  0x41   :  { %564 = vmatprep.subr.mxu0 %v815_v0  ;;  %599 = vmatprep.subr.mxu1 %v815_v0  ;;  %v279_v42 = vld [vmem:[#allocation7 + $0xb8] sm:$0xff]  ;;  %v278_v43 = vld [vmem:[#allocation7 + $0xb0] sm:$0xff]  ;;  %v277_v44 = vld [vmem:[#allocation7 + $0xa8] sm:$0xff] }
  0x42   :  { %565 = vmatpush3.msra.mxu0 %v90_v11  ;;  %600 = vmatpush3.msra.mxu1 %v185_v16  ;;  %v276_v45 = vld [vmem:[#allocation7 + $0xa0] sm:$0xff]  ;;  %v479_v46 = vld [vmem:[%s968_s2] ss:$0 sm:$0xff]  ;;  %v274_v53 = vld [vmem:[#allocation7 + $0x90] sm:$0xff] }
  0x43   :  { %566 = vmatprep.subr.mxu0 %v815_v0  ;;  %601 = vmatprep.subr.mxu1 %v815_v0  ;;  %v275_v52 = vld [vmem:[#allocation7 + $0x98] sm:$0xff]  ;;  %v273_v54 = vld [vmem:[#allocation7 + $0x88] sm:$0xff]  ;;  %v272_v55 = vld [vmem:[#allocation7 + $0x80] sm:$0xff] }
  0x44   :  { %567 = vmatpush3.msra.mxu0 %v89_v13  ;;  %602 = vmatpush3.msra.mxu1 %v184_v18  ;;  %v383_v56 = vld [vmem:[#allocation8 + $0x78] sm:$0xff]  ;;  %v382_v57 = vld [vmem:[#allocation8 + $0x70] sm:$0xff]  ;;  %v381_v58 = vld [vmem:[#allocation8 + $0x68] sm:$0xff] }
  0x45   :  { %568 = vmatprep.subr.mxu0 %v815_v0  ;;  %603 = vmatprep.subr.mxu1 %v815_v0  ;;  %v380_v59 = vld [vmem:[#allocation8 + $0x60] sm:$0xff]  ;;  %v379_v60 = vld [vmem:[#allocation8 + $0x58] sm:$0xff]  ;;  %v378_v61 = vld [vmem:[#allocation8 + $0x50] sm:$0xff] }
  0x46   :  { %569 = vmatpush3.msra.mxu0 %v88_v15  ;;  %604 = vmatpush3.msra.mxu1 %v183_v20  ;;  %v377_v62 = vld [vmem:[#allocation8 + $0x48] sm:$0xff]  ;;  %v376_v63 = vld [vmem:[#allocation8 + $0x40] sm:$0xff]  ;;  %v375_v1 = vld [vmem:[#allocation8 + $0x38] sm:$0xff] }
  0x47   :  { %570 = vmatprep.subr.mxu0 %v815_v0  ;;  %605 = vmatprep.subr.mxu1 %v815_v0  ;;  %v374_v2 = vld [vmem:[#allocation8 + $0x30] sm:$0xff]  ;;  %v373_v3 = vld [vmem:[#allocation8 + $0x28] sm:$0xff]  ;;  %v372_v4 = vld [vmem:[#allocation8 + $0x20] sm:$0xff] }
  0x48   :  { %571 = vmatpush3.msra.mxu0 %v87_v17  ;;  %606 = vmatpush3.msra.mxu1 %v182_v22  ;;  %v480_v5 = vld [vmem:[%s970_s4] ss:$0 sm:$0xff]  ;;  %v370_v12 = vld [vmem:[#allocation8 + $0x10] sm:$0xff]  ;;  %v369_v13 = vld [vmem:[#allocation8 + $0x8] sm:$0xff] }
  0x49   :  { %572 = vmatprep.subr.mxu0 %v815_v0  ;;  %607 = vmatprep.subr.mxu1 %v815_v0  ;;  %v371_v11 = vld [vmem:[#allocation8 + $0x18] sm:$0xff]  ;;  %v368_v14 = vld [vmem:[#allocation8] sm:$0xff] }
  0x4a   :  { %573 = vmatpush3.msra.mxu0 %v86_v19  ;;  %608 = vmatpush3.msra.mxu1 %v181_v24  ;;  %v482_v15 = vld [vmem:[%s970_s4 + $0x1] ss:$0 sm:$0xff] }
  0x4b   :  { %574 = vmatprep.subr.mxu0 %v815_v0  ;;  %609 = vmatprep.subr.mxu1 %v815_v0 }
  0x4c   :  { %575 = vmatpush3.msra.mxu0 %v85_v21  ;;  %610 = vmatpush3.msra.mxu1 %v180_v26  ;;  %v483_v21 = vld [vmem:[%s972_s6] ss:$0 sm:$0xff] }
  0x4d   :  { %576 = vmatprep.subr.mxu0 %v815_v0  ;;  %611 = vmatprep.subr.mxu1 %v815_v0 }
  0x4e   :  { %577 = vmatpush3.msra.mxu0 %v84_v23  ;;  %612 = vmatpush3.msra.mxu1 %v179_v30 }
  0x4f   :  { %578 = vmatprep.subr.mxu0 %v815_v0  ;;  %613 = vmatprep.subr.mxu1 %v815_v0 }
  0x50   :  { %579 = vmatpush3.msra.mxu0 %v83_v25  ;;  %614 = vmatpush3.msra.mxu1 %v178_v31 }
  0x51   :  { %580 = vmatprep.subr.mxu0 %v815_v0  ;;  %615 = vmatprep.subr.mxu1 %v815_v0 }
  0x52   :  { %581 = vmatpush3.msra.mxu0 %v82_v27  ;;  %616 = vmatpush3.msra.mxu1 %v177_v32 }
  0x53   :  { %582 = vmatprep.subr.mxu0 %v815_v0  ;;  %617 = vmatprep.subr.mxu1 %v815_v0 }
  0x54   :  { %583 = vmatpush3.msra.mxu0 %v81_v28  ;;  %618 = vmatpush3.msra.mxu1 %v176_v33 }
  0x55   :  { %585 = vmatmul.mubr.f32.vlgmr.msra.gmra.mxu0 %v80_v29  ;;  %622 = vmatprep.subr.mxu0 %v815_v0 }
  0x56   :  { %654 = vmatprep.mubr.msk.f32.mxu0 %vm816_vm0, %v815_v0  ;;  %657 = vmatprep.subr.mxu1 %v815_v0 }
  0x57   :  { %623 = vmatpush3.msra.mxu0 %v287_v34 }
  0x58   :  { %624 = vmatprep.subr.mxu0 %v815_v0 }
  0x59   :  { %625 = vmatpush3.msra.mxu0 %v286_v35 }
  0x5a   :  { %626 = vmatprep.subr.mxu0 %v815_v0 }
  0x5b   :  { %627 = vmatpush3.msra.mxu0 %v285_v36 }
  0x5c   :  { %628 = vmatprep.subr.mxu0 %v815_v0 }
  0x5d   :  { %629 = vmatpush3.msra.mxu0 %v284_v37 }
  0x5e   :  { %630 = vmatprep.subr.mxu0 %v815_v0 }
  0x5f   :  { %631 = vmatpush3.msra.mxu0 %v283_v38 }
  0x60   :  { %632 = vmatprep.subr.mxu0 %v815_v0 }
  0x61   :  { %633 = vmatpush3.msra.mxu0 %v282_v39 }
  0x62   :  { %634 = vmatprep.subr.mxu0 %v815_v0 }
  0x63   :  { %635 = vmatpush3.msra.mxu0 %v281_v40 }
  0x64   :  { %636 = vmatprep.subr.mxu0 %v815_v0 }
  0x65   :  { %637 = vmatpush3.msra.mxu0 %v280_v41 }
  0x66   :  { %638 = vmatprep.subr.mxu0 %v815_v0 }
  0x67   :  { %639 = vmatpush3.msra.mxu0 %v279_v42 }
  0x68   :  { %640 = vmatprep.subr.mxu0 %v815_v0 }
  0x69   :  { %641 = vmatpush3.msra.mxu0 %v278_v43 }
  0x6a   :  { %642 = vmatprep.subr.mxu0 %v815_v0 }
  0x6b   :  { %643 = vmatpush3.msra.mxu0 %v277_v44 }
  0x6c   :  { %644 = vmatprep.subr.mxu0 %v815_v0 }
  0x6d   :  { %645 = vmatpush3.msra.mxu0 %v276_v45 }
  0x6e   :  { %646 = vmatprep.subr.mxu0 %v815_v0 }
  0x6f   :  { %647 = vmatpush3.msra.mxu0 %v275_v52 }
  0x70   :  { %648 = vmatprep.subr.mxu0 %v815_v0 }
  0x71   :  { %649 = vmatpush3.msra.mxu0 %v274_v53 }
  0x72   :  { %650 = vmatprep.subr.mxu0 %v815_v0 }
  0x73   :  { %651 = vmatpush3.msra.mxu0 %v273_v54 }
  0x74   :  { %652 = vmatprep.subr.mxu0 %v815_v0 }
  0x75   :  { %653 = vmatpush3.msra.mxu0 %v272_v55 }
 0x115   :  { %v170_v47 = vpop.f32.mrf.mxu0 }
 0x116   :  { %v171_v48 = vadd.f32 %v479_v46, %v170_v47 }
 0x117   :  { %v586_v49 = vpop.f32.mrf.mxu0 }
 0x118   :  { %v174_v50 = vmul.f32 0.01, %v171_v48 }
 0x11a   :  { %v175_v51 = vmax.f32 %v171_v48, %v174_v50 }
 0x11c   :  { %620 = vmatmul.mubr.f32.vlgmr.msra.gmra.mxu1 %v175_v51 }
 0x11d   :  { %689 = vmatprep.mubr.msk.f32.mxu1 %vm816_vm0, %v815_v0  ;;  %658 = vmatpush3.msra.mxu1 %v383_v56 }
 0x11e   :  { %659 = vmatprep.subr.mxu1 %v815_v0 }
 0x11f   :  { %660 = vmatpush3.msra.mxu1 %v382_v57 }
 0x120   :  { %661 = vmatprep.subr.mxu1 %v815_v0 }
 0x121   :  { %662 = vmatpush3.msra.mxu1 %v381_v58 }
 0x122   :  { %663 = vmatprep.subr.mxu1 %v815_v0 }
 0x123   :  { %664 = vmatpush3.msra.mxu1 %v380_v59 }
 0x124   :  { %665 = vmatprep.subr.mxu1 %v815_v0 }
 0x125   :  { %666 = vmatpush3.msra.mxu1 %v379_v60 }
 0x126   :  { %667 = vmatprep.subr.mxu1 %v815_v0 }
 0x127   :  { %668 = vmatpush3.msra.mxu1 %v378_v61 }
 0x128   :  { %669 = vmatprep.subr.mxu1 %v815_v0 }
 0x129   :  { %670 = vmatpush3.msra.mxu1 %v377_v62 }
 0x12a   :  { %671 = vmatprep.subr.mxu1 %v815_v0 }
 0x12b   :  { %672 = vmatpush3.msra.mxu1 %v376_v63 }
 0x12c   :  { %673 = vmatprep.subr.mxu1 %v815_v0 }
 0x12d   :  { %674 = vmatpush3.msra.mxu1 %v375_v1 }
 0x12e   :  { %675 = vmatprep.subr.mxu1 %v815_v0 }
 0x12f   :  { %676 = vmatpush3.msra.mxu1 %v374_v2 }
 0x130   :  { %677 = vmatprep.subr.mxu1 %v815_v0 }
 0x131   :  { %678 = vmatpush3.msra.mxu1 %v373_v3 }
 0x132   :  { %679 = vmatprep.subr.mxu1 %v815_v0 }
 0x133   :  { %680 = vmatpush3.msra.mxu1 %v372_v4 }
 0x134   :  { %681 = vmatprep.subr.mxu1 %v815_v0 }
 0x135   :  { %682 = vmatpush3.msra.mxu1 %v371_v11 }
 0x136   :  { %683 = vmatprep.subr.mxu1 %v815_v0 }
 0x137   :  { %684 = vmatpush3.msra.mxu1 %v370_v12 }
 0x138   :  { %685 = vmatprep.subr.mxu1 %v815_v0 }
 0x139   :  { %686 = vmatpush3.msra.mxu1 %v369_v13 }
 0x13a   :  { %687 = vmatprep.subr.mxu1 %v815_v0 }
 0x13b   :  { %688 = vmatpush3.msra.mxu1 %v368_v14 }
 0x1dc   :  { %v265_v6 = vpop.f32.mrf.mxu1 }
 0x1dd   :  { %v266_v7 = vadd.f32 %v480_v5, %v265_v6 }
 0x1de   :  { %v621_v8 = vpop.f32.mrf.mxu1 }
 0x1df   :  { %v269_v9 = vmul.f32 0.01, %v266_v7 }
 0x1e1   :  { %v270_v10 = vmax.f32 %v266_v7, %v269_v9 }
 0x1e3   :  { %655 = vmatmul.mubr.f32.vlgmr.msra.gmra.mxu0 %v270_v10 }
 0x2a3   :  { %v362_v16 = vpop.f32.mrf.mxu0 }
 0x2a4   :  { %v363_v17 = vadd.f32 %v482_v15, %v362_v16 }
 0x2a5   :  { %v656_v18 = vpop.f32.mrf.mxu0 }
 0x2a6   :  { %v366_v19 = vmul.f32 0.01, %v363_v17 }
 0x2a8   :  { %v367_v20 = vmax.f32 %v363_v17, %v366_v19 }
 0x2aa   :  { %690 = vmatmul.mubr.f32.vlgmr.msra.gmra.mxu1 %v367_v20 }
 0x36a   :  { %v457_v22 = vpop.f32.mrf.mxu1 }
 0x36b   :  { %v458_v0 = vadd.f32 %v483_v21, %v457_v22 }
 0x36c   :  { %v691_v23 = vpop.f32.mrf.mxu1 }
 0x36d   :  { %461 = vst [vmem:[#allocation10] sm:$0xff] %v458_v0 }
 0x36e   :  { %792 = shalt.err (!%p789_p10)
}
 0x36f   :  { %471 = dma.vmem_to_hbm [thread:$0]  %s469_s27, 128, %s973_s7, [#allocation4]  }
 0x370   :  { %807 = dma.done.wait [#allocation4], 128  }
 0x371   :  { %808 = vsyncadd [#allocation4], 4294967168 }
 0x372   :  { %475 = vsyncpa [#allocation3], 1 }
 0x373   :  { %476 = vsyncpa [#allocation6], 1 }
 0x374   :  { %477 = vsyncpa [#allocation9], 1 }
 0x375   :  { %478 = vsyncpa [#allocation4], 1 }

// kernel: tpu_custom_call.1
= control target key start
LH: loop header
LB: loop body
LE: loop exit
PB: predicated region body
PF: predicated region fallthrough
CT: control target
= control target key end

     0   :  { %12 = vsyncpa [#allocation3], 0  ;;  %s966_s0 = inlined_call_operand.hbm [shape: f32[8,128], index: 0, kind: input, shape index: {}]   ;;  %s967_s1 = inlined_call_operand.hbm [shape: f32[128,128], index: 1, kind: input, shape index: {}]   ;;  %s968_s2 = inlined_call_operand.vmem [shape: f32[1,128], index: 2, kind: input, shape index: {}]   ;;  %s969_s3 = inlined_call_operand.hbm [shape: f32[2,128,128], index: 3, kind: input, shape index: {}]   ;;  %s970_s4 = inlined_call_operand.vmem [shape: f32[2,1,128], index: 4, kind: input, shape index: {}]   ;;  %s971_s5 = inlined_call_operand.hbm [shape: f32[128,128], index: 5, kind: input, shape index: {}]   ;;  %s972_s6 = inlined_call_operand.vmem [shape: f32[1,128], index: 6, kind: input, shape index: {}]   ;;  %s973_s7 = inlined_call_operand.hbm [shape: f32[8,128], index: 7, kind: output, shape index: {}]  }
   0x1   :  { %13 = vsyncpa [#allocation6], 0 }
   0x2   :  { %14 = vsyncpa [#allocation9], 0 }
   0x3   :  { %15 = vsyncpa [#allocation4], 0  ;;  %s809_s24 = smov [#allocation5]  }
   0x4   :  { %s31_s25 = sshll.u32 %s809_s24, 4  ;;  %s32_s25 = int_to_ptr.vmem [resolvable:$true] %s31_s25 }
   0x5   :  { %s709_s26 = scalar_lea.vmem %s32_s25, 2048  ;;  %p714_p1 = scmp.lt.s32.totalorder %s32_s25, %s32_s25 }
   0x6   :  { %p710_p0 = scmp.ne.s32.totalorder %s32_s25, %s709_s26  ;;  %p715_p2 = scmp.lt.s32.totalorder %s709_s26, %s709_s26 }
   0x8   :  { %p716_p3 = por %p715_p2, %p714_p1 }
   0xa   :  { %p717_p4 = pnand %p716_p3, %p710_p0 }
   0xc   :  { %720 = shalt.err (!%p717_p4)
}
   0xd   :  { %s810_s27 = smov 128   ;;  %s811_s28 = smov 8  }
   0xe   :  { %37 = dma.hbm_to_vmem [thread:$0]  %s967_s1, 2048, %s32_s25, [#allocation6], %s810_s27, %s810_s27, %s811_s28  }
   0xf   :  { %s812_s8 = smov [#allocation2]   ;;  %s813_s10 = smov [#allocation7]  }
  0x10   :  { %s22_s9 = sshll.u32 %s812_s8, 4  ;;  %s45_s11 = sshll.u32 %s813_s10, 4  ;;  %s23_s9 = int_to_ptr.vmem [resolvable:$true] %s22_s9  ;;  %s46_s11 = int_to_ptr.vmem [resolvable:$true] %s45_s11 }
  0x11   :  { %s729_s12 = scalar_lea.vmem %s23_s9, 128  ;;  %p734_p6 = scmp.lt.s32.totalorder %s23_s9, %s23_s9 }
  0x12   :  { %p730_p5 = scmp.ne.s32.totalorder %s23_s9, %s729_s12  ;;  %p735_p7 = scmp.lt.s32.totalorder %s729_s12, %s729_s12 }
  0x14   :  { %p736_p8 = por %p735_p7, %p734_p6 }
  0x16   :  { %p737_p9 = pnand %p736_p8, %p730_p5 }
  0x18   :  { %740 = shalt.err (!%p737_p9)
}
  0x19   :  { %25 = dma.hbm_to_vmem [thread:$0]  %s966_s0, 128, %s23_s9, [#allocation3]  }
  0x1a   :  { %s749_s15 = scalar_lea.vmem %s46_s11, 4096  ;;  %p754_p11 = scmp.lt.s32.totalorder %s46_s11, %s46_s11 }
  0x1b   :  { %p750_p10 = scmp.ne.s32.totalorder %s46_s11, %s749_s15  ;;  %p755_p12 = scmp.lt.s32.totalorder %s749_s15, %s749_s15 }
  0x1d   :  { %p756_p13 = por %p755_p12, %p754_p11 }
  0x1f   :  { %p757_p0 = pnand %p756_p13, %p750_p10 }
  0x21   :  { %760 = shalt.err (!%p757_p0)
}
  0x22   :  { %51 = dma.hbm_to_vmem [thread:$0]  %s969_s3, 4096, %s46_s11, [#allocation6], %s810_s27, %s810_s27, %s811_s28  }
  0x23   :  { %s814_s17 = smov [#allocation8]  }
  0x24   :  { %s59_s18 = sshll.u32 %s814_s17, 4  ;;  %s60_s18 = int_to_ptr.vmem [resolvable:$true] %s59_s18 }
  0x25   :  { %s769_s19 = scalar_lea.vmem %s60_s18, 2048  ;;  %p774_p2 = scmp.lt.s32.totalorder %s60_s18, %s60_s18 }
  0x26   :  { %p770_p1 = scmp.ne.s32.totalorder %s60_s18, %s769_s19  ;;  %p775_p3 = scmp.lt.s32.totalorder %s769_s19, %s769_s19 }
  0x28   :  { %p776_p4 = por %p775_p3, %p774_p2 }
  0x2a   :  { %p777_p5 = pnand %p776_p4, %p770_p1 }
  0x2c   :  { %780 = shalt.err (!%p777_p5)
}
  0x2d   :  { %65 = dma.hbm_to_vmem [thread:$0]  %s971_s5, 2048, %s60_s18, [#allocation9], %s810_s27, %s810_s27, %s811_s28  }
  0x2e   :  { %801 = dma.done.wait [#allocation3], 128  }
  0x2f   :  { %802 = vsyncadd [#allocation3], 4294967168 }
  0x30   :  { %803 = dma.done.wait [#allocation6], 6144  }
  0x31   :  { %804 = vsyncadd [#allocation6], 4294961152 }
  0x32   :  { %805 = dma.done.wait [#allocation9], 2048  }
  0x33   :  { %806 = vsyncadd [#allocation9], 4294965248  ;;  %v815_v0 = vmov 0.0   ;;  %vm816_vm0 = vmmov 0   ;;  %v96_v1 = vld [vmem:[#allocation5 + $0x78] sm:$0xff]  ;;  %v95_v2 = vld [vmem:[#allocation5 + $0x70] sm:$0xff] }
  0x34   :  { %552 = vmatprep.subr.mxu0 %v815_v0  ;;  %584 = vmatprep.mubr.msk.f32.mxu0 %vm816_vm0, %v815_v0  ;;  %v94_v3 = vld [vmem:[#allocation5 + $0x68] sm:$0xff]  ;;  %v93_v4 = vld [vmem:[#allocation5 + $0x60] sm:$0xff]  ;;  %v191_v5 = vld [vmem:[#allocation7 + $0x78] sm:$0xff]  ;;  %s817_s26 = smov [#allocation10]  }
  0x35   :  { %587 = vmatprep.subr.mxu1 %v815_v0  ;;  %619 = vmatprep.mubr.msk.f32.mxu1 %vm816_vm0, %v815_v0  ;;  %v92_v6 = vld [vmem:[#allocation5 + $0x58] sm:$0xff]  ;;  %v190_v7 = vld [vmem:[#allocation7 + $0x70] sm:$0xff]  ;;  %v189_v8 = vld [vmem:[#allocation7 + $0x68] sm:$0xff]  ;;  %s468_s27 = sshll.u32 %s817_s26, 4  ;;  %s469_s27 = int_to_ptr.vmem [resolvable:$true] %s468_s27 }
  0x36   :  { %553 = vmatpush3.msra.mxu0 %v96_v1  ;;  %588 = vmatpush3.msra.mxu1 %v191_v5  ;;  %v91_v9 = vld [vmem:[#allocation5 + $0x50] sm:$0xff]  ;;  %v188_v10 = vld [vmem:[#allocation7 + $0x60] sm:$0xff]  ;;  %v90_v11 = vld [vmem:[#allocation5 + $0x48] sm:$0xff]  ;;  %s781_s28 = scalar_lea.vmem %s469_s27, 128  ;;  %p786_p7 = scmp.lt.s32.totalorder %s469_s27, %s469_s27 }
  0x37   :  { %554 = vmatprep.subr.mxu0 %v815_v0  ;;  %589 = vmatprep.subr.mxu1 %v815_v0  ;;  %v187_v12 = vld [vmem:[#allocation7 + $0x58] sm:$0xff]  ;;  %v89_v13 = vld [vmem:[#allocation5 + $0x40] sm:$0xff]  ;;  %v186_v14 = vld [vmem:[#allocation7 + $0x50] sm:$0xff]  ;;  %p782_p6 = scmp.ne.s32.totalorder %s469_s27, %s781_s28  ;;  %p787_p8 = scmp.lt.s32.totalorder %s781_s28, %s781_s28 }
  0x38   :  { %555 = vmatpush3.msra.mxu0 %v95_v2  ;;  %590 = vmatpush3.msra.mxu1 %v190_v7  ;;  %v88_v15 = vld [vmem:[#allocation5 + $0x38] sm:$0xff]  ;;  %v185_v16 = vld [vmem:[#allocation7 + $0x48] sm:$0xff]  ;;  %v87_v17 = vld [vmem:[#allocation5 + $0x30] sm:$0xff] }
  0x39   :  { %556 = vmatprep.subr.mxu0 %v815_v0  ;;  %591 = vmatprep.subr.mxu1 %v815_v0  ;;  %v184_v18 = vld [vmem:[#allocation7 + $0x40] sm:$0xff]  ;;  %v86_v19 = vld [vmem:[#allocation5 + $0x28] sm:$0xff]  ;;  %v183_v20 = vld [vmem:[#allocation7 + $0x38] sm:$0xff]  ;;  %p788_p9 = por %p787_p8, %p786_p7 }
  0x3a   :  { %557 = vmatpush3.msra.mxu0 %v94_v3  ;;  %592 = vmatpush3.msra.mxu1 %v189_v8  ;;  %v85_v21 = vld [vmem:[#allocation5 + $0x20] sm:$0xff]  ;;  %v182_v22 = vld [vmem:[#allocation7 + $0x30] sm:$0xff]  ;;  %v84_v23 = vld [vmem:[#allocation5 + $0x18] sm:$0xff] }
  0x3b   :  { %558 = vmatprep.subr.mxu0 %v815_v0  ;;  %593 = vmatprep.subr.mxu1 %v815_v0  ;;  %v181_v24 = vld [vmem:[#allocation7 + $0x28] sm:$0xff]  ;;  %v83_v25 = vld [vmem:[#allocation5 + $0x10] sm:$0xff]  ;;  %v180_v26 = vld [vmem:[#allocation7 + $0x20] sm:$0xff]  ;;  %p789_p10 = pnand %p788_p9, %p782_p6 }
  0x3c   :  { %559 = vmatpush3.msra.mxu0 %v93_v4  ;;  %594 = vmatpush3.msra.mxu1 %v188_v10  ;;  %v82_v27 = vld [vmem:[#allocation5 + $0x8] sm:$0xff]  ;;  %v81_v28 = vld [vmem:[#allocation5] sm:$0xff]  ;;  %v80_v29 = vld [vmem:[#allocation2] sm:$0xff] }
  0x3d   :  { %560 = vmatprep.subr.mxu0 %v815_v0  ;;  %595 = vmatprep.subr.mxu1 %v815_v0  ;;  %v179_v30 = vld [vmem:[#allocation7 + $0x18] sm:$0xff]  ;;  %v178_v31 = vld [vmem:[#allocation7 + $0x10] sm:$0xff]  ;;  %v177_v32 = vld [vmem:[#allocation7 + $0x8] sm:$0xff] }
  0x3e   :  { %561 = vmatpush3.msra.mxu0 %v92_v6  ;;  %596 = vmatpush3.msra.mxu1 %v187_v12  ;;  %v176_v33 = vld [vmem:[#allocation7] sm:$0xff]  ;;  %v287_v34 = vld [vmem:[#allocation7 + $0xf8] sm:$0xff]  ;;  %v286_v35 = vld [vmem:[#allocation7 + $0xf0] sm:$0xff] }
  0x3f   :  { %562 = vmatprep.subr.mxu0 %v815_v0  ;;  %597 = vmatprep.subr.mxu1 %v815_v0  ;;  %v285_v36 = vld [vmem:[#allocation7 + $0xe8] sm:$0xff]  ;;  %v284_v37 = vld [vmem:[#allocation7 + $0xe0] sm:$0xff]  ;;  %v283_v38 = vld [vmem:[#allocation7 + $0xd8] sm:$0xff] }
  0x40   :  { %563 = vmatpush3.msra.mxu0 %v91_v9  ;;  %598 = vmatpush3.msra.mxu1 %v186_v14  ;;  %v282_v39 = vld [vmem:[#allocation7 + $0xd0] sm:$0xff]  ;;  %v281_v40 = vld [vmem:[#allocation7 + $0xc8] sm:$0xff]  ;;  %v280_v41 = vld [vmem:[#allocation7 + $0xc0] sm:$0xff] }
  0x41   :  { %564 = vmatprep.subr.mxu0 %v815_v0  ;;  %599 = vmatprep.subr.mxu1 %v815_v0  ;;  %v279_v42 = vld [vmem:[#allocation7 + $0xb8] sm:$0xff]  ;;  %v278_v43 = vld [vmem:[#allocation7 + $0xb0] sm:$0xff]  ;;  %v277_v44 = vld [vmem:[#allocation7 + $0xa8] sm:$0xff] }
  0x42   :  { %565 = vmatpush3.msra.mxu0 %v90_v11  ;;  %600 = vmatpush3.msra.mxu1 %v185_v16  ;;  %v276_v45 = vld [vmem:[#allocation7 + $0xa0] sm:$0xff]  ;;  %v479_v46 = vld [vmem:[%s968_s2] ss:$0 sm:$0xff]  ;;  %v274_v53 = vld [vmem:[#allocation7 + $0x90] sm:$0xff] }
  0x43   :  { %566 = vmatprep.subr.mxu0 %v815_v0  ;;  %601 = vmatprep.subr.mxu1 %v815_v0  ;;  %v275_v52 = vld [vmem:[#allocation7 + $0x98] sm:$0xff]  ;;  %v273_v54 = vld [vmem:[#allocation7 + $0x88] sm:$0xff]  ;;  %v272_v55 = vld [vmem:[#allocation7 + $0x80] sm:$0xff] }
  0x44   :  { %567 = vmatpush3.msra.mxu0 %v89_v13  ;;  %602 = vmatpush3.msra.mxu1 %v184_v18  ;;  %v383_v56 = vld [vmem:[#allocation8 + $0x78] sm:$0xff]  ;;  %v382_v57 = vld [vmem:[#allocation8 + $0x70] sm:$0xff]  ;;  %v381_v58 = vld [vmem:[#allocation8 + $0x68] sm:$0xff] }
  0x45   :  { %568 = vmatprep.subr.mxu0 %v815_v0  ;;  %603 = vmatprep.subr.mxu1 %v815_v0  ;;  %v380_v59 = vld [vmem:[#allocation8 + $0x60] sm:$0xff]  ;;  %v379_v60 = vld [vmem:[#allocation8 + $0x58] sm:$0xff]  ;;  %v378_v61 = vld [vmem:[#allocation8 + $0x50] sm:$0xff] }
  0x46   :  { %569 = vmatpush3.msra.mxu0 %v88_v15  ;;  %604 = vmatpush3.msra.mxu1 %v183_v20  ;;  %v377_v62 = vld [vmem:[#allocation8 + $0x48] sm:$0xff]  ;;  %v376_v63 = vld [vmem:[#allocation8 + $0x40] sm:$0xff]  ;;  %v375_v1 = vld [vmem:[#allocation8 + $0x38] sm:$0xff] }
  0x47   :  { %570 = vmatprep.subr.mxu0 %v815_v0  ;;  %605 = vmatprep.subr.mxu1 %v815_v0  ;;  %v374_v2 = vld [vmem:[#allocation8 + $0x30] sm:$0xff]  ;;  %v373_v3 = vld [vmem:[#allocation8 + $0x28] sm:$0xff]  ;;  %v372_v4 = vld [vmem:[#allocation8 + $0x20] sm:$0xff] }
  0x48   :  { %571 = vmatpush3.msra.mxu0 %v87_v17  ;;  %606 = vmatpush3.msra.mxu1 %v182_v22  ;;  %v480_v5 = vld [vmem:[%s970_s4] ss:$0 sm:$0xff]  ;;  %v370_v12 = vld [vmem:[#allocation8 + $0x10] sm:$0xff]  ;;  %v369_v13 = vld [vmem:[#allocation8 + $0x8] sm:$0xff] }
  0x49   :  { %572 = vmatprep.subr.mxu0 %v815_v0  ;;  %607 = vmatprep.subr.mxu1 %v815_v0  ;;  %v371_v11 = vld [vmem:[#allocation8 + $0x18] sm:$0xff]  ;;  %v368_v14 = vld [vmem:[#allocation8] sm:$0xff] }
  0x4a   :  { %573 = vmatpush3.msra.mxu0 %v86_v19  ;;  %608 = vmatpush3.msra.mxu1 %v181_v24  ;;  %v482_v15 = vld [vmem:[%s970_s4 + $0x1] ss:$0 sm:$0xff] }
  0x4b   :  { %574 = vmatprep.subr.mxu0 %v815_v0  ;;  %609 = vmatprep.subr.mxu1 %v815_v0 }
  0x4c   :  { %575 = vmatpush3.msra.mxu0 %v85_v21  ;;  %610 = vmatpush3.msra.mxu1 %v180_v26  ;;  %v483_v21 = vld [vmem:[%s972_s6] ss:$0 sm:$0xff] }
  0x4d   :  { %576 = vmatprep.subr.mxu0 %v815_v0  ;;  %611 = vmatprep.subr.mxu1 %v815_v0 }
  0x4e   :  { %577 = vmatpush3.msra.mxu0 %v84_v23  ;;  %612 = vmatpush3.msra.mxu1 %v179_v30 }
  0x4f   :  { %578 = vmatprep.subr.mxu0 %v815_v0  ;;  %613 = vmatprep.subr.mxu1 %v815_v0 }
  0x50   :  { %579 = vmatpush3.msra.mxu0 %v83_v25  ;;  %614 = vmatpush3.msra.mxu1 %v178_v31 }
  0x51   :  { %580 = vmatprep.subr.mxu0 %v815_v0  ;;  %615 = vmatprep.subr.mxu1 %v815_v0 }
  0x52   :  { %581 = vmatpush3.msra.mxu0 %v82_v27  ;;  %616 = vmatpush3.msra.mxu1 %v177_v32 }
  0x53   :  { %582 = vmatprep.subr.mxu0 %v815_v0  ;;  %617 = vmatprep.subr.mxu1 %v815_v0 }
  0x54   :  { %583 = vmatpush3.msra.mxu0 %v81_v28  ;;  %618 = vmatpush3.msra.mxu1 %v176_v33 }
  0x55   :  { %585 = vmatmul.mubr.f32.vlgmr.msra.gmra.mxu0 %v80_v29  ;;  %622 = vmatprep.subr.mxu0 %v815_v0 }
  0x56   :  { %654 = vmatprep.mubr.msk.f32.mxu0 %vm816_vm0, %v815_v0  ;;  %657 = vmatprep.subr.mxu1 %v815_v0 }
  0x57   :  { %623 = vmatpush3.msra.mxu0 %v287_v34 }
  0x58   :  { %624 = vmatprep.subr.mxu0 %v815_v0 }
  0x59   :  { %625 = vmatpush3.msra.mxu0 %v286_v35 }
  0x5a   :  { %626 = vmatprep.subr.mxu0 %v815_v0 }
  0x5b   :  { %627 = vmatpush3.msra.mxu0 %v285_v36 }
  0x5c   :  { %628 = vmatprep.subr.mxu0 %v815_v0 }
  0x5d   :  { %629 = vmatpush3.msra.mxu0 %v284_v37 }
  0x5e   :  { %630 = vmatprep.subr.mxu0 %v815_v0 }
  0x5f   :  { %631 = vmatpush3.msra.mxu0 %v283_v38 }
  0x60   :  { %632 = vmatprep.subr.mxu0 %v815_v0 }
  0x61   :  { %633 = vmatpush3.msra.mxu0 %v282_v39 }
  0x62   :  { %634 = vmatprep.subr.mxu0 %v815_v0 }
  0x63   :  { %635 = vmatpush3.msra.mxu0 %v281_v40 }
  0x64   :  { %636 = vmatprep.subr.mxu0 %v815_v0 }
  0x65   :  { %637 = vmatpush3.msra.mxu0 %v280_v41 }
  0x66   :  { %638 = vmatprep.subr.mxu0 %v815_v0 }
  0x67   :  { %639 = vmatpush3.msra.mxu0 %v279_v42 }
  0x68   :  { %640 = vmatprep.subr.mxu0 %v815_v0 }
  0x69   :  { %641 = vmatpush3.msra.mxu0 %v278_v43 }
  0x6a   :  { %642 = vmatprep.subr.mxu0 %v815_v0 }
  0x6b   :  { %643 = vmatpush3.msra.mxu0 %v277_v44 }
  0x6c   :  { %644 = vmatprep.subr.mxu0 %v815_v0 }
  0x6d   :  { %645 = vmatpush3.msra.mxu0 %v276_v45 }
  0x6e   :  { %646 = vmatprep.subr.mxu0 %v815_v0 }
  0x6f   :  { %647 = vmatpush3.msra.mxu0 %v275_v52 }
  0x70   :  { %648 = vmatprep.subr.mxu0 %v815_v0 }
  0x71   :  { %649 = vmatpush3.msra.mxu0 %v274_v53 }
  0x72   :  { %650 = vmatprep.subr.mxu0 %v815_v0 }
  0x73   :  { %651 = vmatpush3.msra.mxu0 %v273_v54 }
  0x74   :  { %652 = vmatprep.subr.mxu0 %v815_v0 }
  0x75   :  { %653 = vmatpush3.msra.mxu0 %v272_v55 }
 0x115   :  { %v170_v47 = vpop.f32.mrf.mxu0 }
 0x116   :  { %v171_v48 = vadd.f32 %v479_v46, %v170_v47 }
 0x117   :  { %v586_v49 = vpop.f32.mrf.mxu0 }
 0x118   :  { %v174_v50 = vmul.f32 0.01, %v171_v48 }
 0x11a   :  { %v175_v51 = vmax.f32 %v171_v48, %v174_v50 }
 0x11c   :  { %620 = vmatmul.mubr.f32.vlgmr.msra.gmra.mxu1 %v175_v51 }
 0x11d   :  { %689 = vmatprep.mubr.msk.f32.mxu1 %vm816_vm0, %v815_v0  ;;  %658 = vmatpush3.msra.mxu1 %v383_v56 }
 0x11e   :  { %659 = vmatprep.subr.mxu1 %v815_v0 }
 0x11f   :  { %660 = vmatpush3.msra.mxu1 %v382_v57 }
 0x120   :  { %661 = vmatprep.subr.mxu1 %v815_v0 }
 0x121   :  { %662 = vmatpush3.msra.mxu1 %v381_v58 }
 0x122   :  { %663 = vmatprep.subr.mxu1 %v815_v0 }
 0x123   :  { %664 = vmatpush3.msra.mxu1 %v380_v59 }
 0x124   :  { %665 = vmatprep.subr.mxu1 %v815_v0 }
 0x125   :  { %666 = vmatpush3.msra.mxu1 %v379_v60 }
 0x126   :  { %667 = vmatprep.subr.mxu1 %v815_v0 }
 0x127   :  { %668 = vmatpush3.msra.mxu1 %v378_v61 }
 0x128   :  { %669 = vmatprep.subr.mxu1 %v815_v0 }
 0x129   :  { %670 = vmatpush3.msra.mxu1 %v377_v62 }
 0x12a   :  { %671 = vmatprep.subr.mxu1 %v815_v0 }
 0x12b   :  { %672 = vmatpush3.msra.mxu1 %v376_v63 }
 0x12c   :  { %673 = vmatprep.subr.mxu1 %v815_v0 }
 0x12d   :  { %674 = vmatpush3.msra.mxu1 %v375_v1 }
 0x12e   :  { %675 = vmatprep.subr.mxu1 %v815_v0 }
 0x12f   :  { %676 = vmatpush3.msra.mxu1 %v374_v2 }
 0x130   :  { %677 = vmatprep.subr.mxu1 %v815_v0 }
 0x131   :  { %678 = vmatpush3.msra.mxu1 %v373_v3 }
 0x132   :  { %679 = vmatprep.subr.mxu1 %v815_v0 }
 0x133   :  { %680 = vmatpush3.msra.mxu1 %v372_v4 }
 0x134   :  { %681 = vmatprep.subr.mxu1 %v815_v0 }
 0x135   :  { %682 = vmatpush3.msra.mxu1 %v371_v11 }
 0x136   :  { %683 = vmatprep.subr.mxu1 %v815_v0 }
 0x137   :  { %684 = vmatpush3.msra.mxu1 %v370_v12 }
 0x138   :  { %685 = vmatprep.subr.mxu1 %v815_v0 }
 0x139   :  { %686 = vmatpush3.msra.mxu1 %v369_v13 }
 0x13a   :  { %687 = vmatprep.subr.mxu1 %v815_v0 }
 0x13b   :  { %688 = vmatpush3.msra.mxu1 %v368_v14 }
 0x1dc   :  { %v265_v6 = vpop.f32.mrf.mxu1 }
 0x1dd   :  { %v266_v7 = vadd.f32 %v480_v5, %v265_v6 }
 0x1de   :  { %v621_v8 = vpop.f32.mrf.mxu1 }
 0x1df   :  { %v269_v9 = vmul.f32 0.01, %v266_v7 }
 0x1e1   :  { %v270_v10 = vmax.f32 %v266_v7, %v269_v9 }
 0x1e3   :  { %655 = vmatmul.mubr.f32.vlgmr.msra.gmra.mxu0 %v270_v10 }
 0x2a3   :  { %v362_v16 = vpop.f32.mrf.mxu0 }
 0x2a4   :  { %v363_v17 = vadd.f32 %v482_v15, %v362_v16 }
 0x2a5   :  { %v656_v18 = vpop.f32.mrf.mxu0 }
 0x2a6   :  { %v366_v19 = vmul.f32 0.01, %v363_v17 }
 0x2a8   :  { %v367_v20 = vmax.f32 %v363_v17, %v366_v19 }
 0x2aa   :  { %690 = vmatmul.mubr.f32.vlgmr.msra.gmra.mxu1 %v367_v20 }
 0x36a   :  { %v457_v22 = vpop.f32.mrf.mxu1 }
 0x36b   :  { %v458_v0 = vadd.f32 %v483_v21, %v457_v22 }
 0x36c   :  { %v691_v23 = vpop.f32.mrf.mxu1 }
 0x36d   :  { %461 = vst [vmem:[#allocation10] sm:$0xff] %v458_v0 }
 0x36e   :  { %792 = shalt.err (!%p789_p10)
}
 0x36f   :  { %471 = dma.vmem_to_hbm [thread:$0]  %s469_s27, 128, %s973_s7, [#allocation4]  }
 0x370   :  { %807 = dma.done.wait [#allocation4], 128  }
 0x371   :  { %808 = vsyncadd [#allocation4], 4294967168 }
 0x372   :  { %475 = vsyncpa [#allocation3], 1 }
 0x373   :  { %476 = vsyncpa [#allocation6], 1 }
 0x374   :  { %477 = vsyncpa [#allocation9], 1 }
 0x375   :  { %478 = vsyncpa [#allocation4], 1 }

</bundles_post_ra>
